<compile_context>
chip_gen: v7x
topology: tpu7x:2x2x1
jax: 0.10.0
libtpu: 0.0.40
codegen_flags: <defaults>
</compile_context>

<pallas_src>
import math

import jax
import jax.numpy as jnp
from jax.experimental import pallas as pl
from jax.experimental.pallas import tpu as pltpu


# ----------------------------------------------------------------------------
# SyntaxAwareGCN layer kernel body (one (batch-tile, row-tile) block per step)
# ----------------------------------------------------------------------------
def _sgcn_body(x_ref, adj_ref, dep_ref, pos_ref,
               waxs_ref, waps_ref, wads_ref,
               ba_ref, wd_ref, bd_ref, wp_ref, bp_ref,
               out_ref, wa_ref=None, r_ref=None):
    Bt, St, D = x_ref.shape
    S = adj_ref.shape[-1]
    dep_dim = dep_ref.shape[-1]
    P = pos_ref.shape[-1]
    M = Bt * St

    x2 = x_ref[...].reshape(M, D)                       # [M, D]
    pos2 = pos_ref[...].reshape(M, P)                   # [M, P]
    adj2 = adj_ref[...].reshape(M, S)                   # [M, S]
    dep_flat = dep_ref[...].reshape(M * S, dep_dim)     # [M*S, dep]

    ba = ba_ref[...]                                    # [1, D]
    ba_sum = jnp.sum(ba, keepdims=True)                 # [1, 1]

    # ---- softmax logits: p[m, j] = sum_d r[m, j, d], without building r ----
    qi = (jnp.dot(x2, waxs_ref[...], preferred_element_type=jnp.float32)
          + jnp.dot(pos2, waps_ref[...], preferred_element_type=jnp.float32))   # [M, 1]
    dj = jnp.dot(dep_flat, wads_ref[...],
                 preferred_element_type=jnp.float32).reshape(M, S)               # [M, S]
    logits = qi + dj + ba_sum
    logits = logits + jnp.where(adj2 == 0.0, jnp.float32(-1e30), jnp.float32(0.0))

    mrow = jnp.max(logits, axis=-1, keepdims=True)
    e = jnp.exp(logits - mrow)
    denom = jnp.sum(e, axis=-1, keepdims=True)
    p = e * pl.reciprocal(denom, approx=True)            # [M, S]
    prow = jnp.sum(p, axis=-1, keepdims=True)            # [M, 1]  (== 1 up to eps)

    # ---- weighted aggregation: contract p with dep (narrow) before projecting to D
    pos_fc = (jnp.dot(pos2, wp_ref[...], preferred_element_type=jnp.float32)
              + bp_ref[...])                              # [M, D]
    dep3 = dep_flat.reshape(M, S, dep_dim)                # [M, S, dep]
    t = jnp.sum(p[:, :, None] * dep3, axis=1)             # [M, dep]
    dep_term = jnp.dot(t, wd_ref[...], preferred_element_type=jnp.float32)  # [M, D]
    out2 = (x2 + pos_fc) * prow + dep_term + bd_ref[...] * prow
    out_ref[...] = out2.reshape(Bt, St, D)

    # ---- r is only materialized when the caller actually returns it (last layer)
    if r_ref is not None:
        wa = wa_ref[...]                                  # [D + P + dep, D]
        wa_x = wa[:D, :]
        wa_p = wa[D:D + P, :]
        wa_d = wa[D + P:, :]
        r_qi = (jnp.dot(x2, wa_x, preferred_element_type=jnp.float32)
                + jnp.dot(pos2, wa_p, preferred_element_type=jnp.float32)
                + ba)                                     # [M, D]
        r_d = jnp.dot(dep_flat, wa_d,
                      preferred_element_type=jnp.float32).reshape(M, S, D)
        r = r_qi[:, None, :] + r_d                        # [M, S, D]
        r_ref[...] = r.reshape(Bt, St, S, D)


def _sgcn_kernel_no_r(x, adj, dep, pos, waxs, waps, wads,
                      ba, wd, bd, wp, bp, out):
    _sgcn_body(x, adj, dep, pos, waxs, waps, wads, ba, wd, bd, wp, bp, out)


def _sgcn_kernel_with_r(x, adj, dep, pos, waxs, waps, wads, wa,
                        ba, wd, bd, wp, bp, out, r):
    _sgcn_body(x, adj, dep, pos, waxs, waps, wads, ba, wd, bd, wp, bp, out,
               wa_ref=wa, r_ref=r)


# ----------------------------------------------------------------------------
# One SyntaxAwareGCN layer
# ----------------------------------------------------------------------------
def sgcn_layer(x, adj, dep_embed, pos_embed, lp, *, emit_r,
               block_b=None, block_s=None):
    B, S, D = x.shape
    dep_dim = dep_embed.shape[-1]
    P = pos_embed.shape[-1]

    Bt = block_b if block_b is not None else B       # fold whole batch into M by default
    St = block_s if block_s is not None else S       # full row extent by default
    assert B % Bt == 0 and S % St == 0
    assert St == S or St % 8 == 0, "row tile must be full S or a multiple of 8"

    # Collapsed weight vectors for the softmax logits (sum over the output dim).
    wa = lp["wa"]
    waxs = wa[:D].sum(axis=1, keepdims=True)          # [D, 1]
    waps = wa[D:D + P].sum(axis=1, keepdims=True)     # [P, 1]
    wads = wa[D + P:].sum(axis=1, keepdims=True)      # [dep, 1]

    grid = (B // Bt, S // St)

    def full2d(arr):
        return pl.BlockSpec(arr.shape, lambda bi, si: (0, 0))

    data_specs = [
        pl.BlockSpec((Bt, St, D), lambda bi, si: (bi, si, 0)),
        pl.BlockSpec((Bt, St, S), lambda bi, si: (bi, si, 0)),
        pl.BlockSpec((Bt, St, S, dep_dim), lambda bi, si: (bi, si, 0, 0)),
        pl.BlockSpec((Bt, St, P), lambda bi, si: (bi, si, 0)),
    ]
    small_specs = [full2d(waxs), full2d(waps), full2d(wads)]
    weight_specs = [full2d(lp["ba"]), full2d(lp["wd"]), full2d(lp["bd"]),
                    full2d(lp["wp"]), full2d(lp["bp"])]

    out_block = pl.BlockSpec((Bt, St, D), lambda bi, si: (bi, si, 0))
    cparams = pltpu.CompilerParams(dimension_semantics=("parallel", "parallel"))

    if emit_r:
        out, r = pl.pallas_call(
            _sgcn_kernel_with_r,
            out_shape=(jax.ShapeDtypeStruct((B, S, D), jnp.float32),
                       jax.ShapeDtypeStruct((B, S, S, D), jnp.float32)),
            grid=grid,
            in_specs=data_specs + small_specs + [full2d(wa)] + weight_specs,
            out_specs=(out_block,
                       pl.BlockSpec((Bt, St, S, D), lambda bi, si: (bi, si, 0, 0))),
            compiler_params=cparams,
        )(x, adj, dep_embed, pos_embed, waxs, waps, wads, wa,
          lp["ba"], lp["wd"], lp["bd"], lp["wp"], lp["bp"])
        return out, r
    else:
        out = pl.pallas_call(
            _sgcn_kernel_no_r,
            out_shape=jax.ShapeDtypeStruct((B, S, D), jnp.float32),
            grid=grid,
            in_specs=data_specs + small_specs + weight_specs,
            out_specs=out_block,
            compiler_params=cparams,
        )(x, adj, dep_embed, pos_embed, waxs, waps, wads,
          lp["ba"], lp["wd"], lp["bd"], lp["wp"], lp["bp"])
        return out


# ----------------------------------------------------------------------------
# Parameters (deterministic init; shapes per SyntaxAwareGCN / SGCN __init__)
# ----------------------------------------------------------------------------
def _linear_init(key, fan_in, fan_out):
    bound = 1.0 / math.sqrt(fan_in)
    kw, kb = jax.random.split(key)
    w = jax.random.uniform(kw, (fan_in, fan_out), jnp.float32, -bound, bound)
    b = jax.random.uniform(kb, (1, fan_out), jnp.float32, -bound, bound)
    return w, b


def init_params(key, opt):
    D, dep, P = opt["bert_feature_dim"], opt["dep_dim"], opt["pos_dim"]
    keys = jax.random.split(key, 1 + 3 * opt["num_layer"])

    dep_emb = jax.random.normal(keys[0], (opt["dep_num"], dep), jnp.float32)
    dep_emb = dep_emb.at[0].set(0.0)                  # padding_idx=0

    layers = []
    k = 1
    for _ in range(opt["num_layer"]):
        wa, ba = _linear_init(keys[k], D + P + dep, D)      # dep_attn ([x, pos, dep] cat order)
        wd, bd = _linear_init(keys[k + 1], dep, D)          # dep_fc
        wp, bp = _linear_init(keys[k + 2], P, D)            # pos_fc
        # shrinker / shrinker_2 are declared in torch but unused in forward.
        layers.append(dict(wa=wa, ba=ba, wd=wd, bd=bd, wp=wp, bp=bp))
        k += 3
    return dict(dep_emb=dep_emb, layers=layers)


# ----------------------------------------------------------------------------
# SGCN forward: x, simple_graph, graph, pos_embed -> (x_out, r_last)
# ----------------------------------------------------------------------------
def sgcn_forward(params, x, simple_graph, graph, pos_embed,
                 *, block_b=None, block_s=None):
    # dep_embedding lookup (plain-JAX glue; padding row 0 is zero)
    dep_embed = jnp.take(params["dep_emb"], graph, axis=0)   # [B, S, S, dep]
    adj = simple_graph.astype(jnp.float32)

    h = x
    r = None
    n_layers = len(params["layers"])
    for li, lp in enumerate(params["layers"]):
        if li == n_layers - 1:
            h, r = sgcn_layer(h, adj, dep_embed, pos_embed, lp, emit_r=True,
                              block_b=block_b, block_s=block_s)
        else:
            h = sgcn_layer(h, adj, dep_embed, pos_embed, lp, emit_r=False,
                           block_b=block_b, block_s=block_s)
    return h, r


# ----------------------------------------------------------------------------
if __name__ == "__main__":
    opt = dict(bert_feature_dim=32, dep_dim=8, pos_dim=8, num_layer=2, dep_num=16)
    B, S = 2, 8

    params = init_params(jax.random.PRNGKey(0), opt)

    k1, k2, k3, k4 = jax.random.split(jax.random.PRNGKey(0), 4)
    x = jax.random.normal(k1, (B, S, opt["bert_feature_dim"]), jnp.float32)
    simple_graph = (jax.random.uniform(k2, (B, S, S)) > 0.4).astype(jnp.float32)
    graph = jax.random.randint(k3, (B, S, S), 0, opt["dep_num"])
    pos_embed = jax.random.normal(k4, (B, S, opt["pos_dim"]), jnp.float32)

    out, r_last = sgcn_forward(params, x, simple_graph, graph, pos_embed)
    jax.block_until_ready((out, r_last))
    assert out.shape == (B, S, opt["bert_feature_dim"])
    assert r_last.shape == (B, S, S, opt["bert_feature_dim"])
    print("KERNEL_OK")
</pallas_src>

<mosaic_0001>
module attributes {stable_mosaic.version = 11 : i64} {
  func.func @_sgcn_kernel_no_r(%arg0: i32, %arg1: i32, %arg2: memref<2x8x32xf32, #tpu.memory_space<vmem>>, %arg3: memref<2x8x8xf32, #tpu.memory_space<vmem>>, %arg4: memref<2x8x8x8xf32, #tpu.memory_space<vmem>>, %arg5: memref<2x8x8xf32, #tpu.memory_space<vmem>>, %arg6: memref<32x1xf32, #tpu.memory_space<vmem>>, %arg7: memref<8x1xf32, #tpu.memory_space<vmem>>, %arg8: memref<8x1xf32, #tpu.memory_space<vmem>>, %arg9: memref<1x32xf32, #tpu.memory_space<vmem>>, %arg10: memref<8x32xf32, #tpu.memory_space<vmem>>, %arg11: memref<1x32xf32, #tpu.memory_space<vmem>>, %arg12: memref<8x32xf32, #tpu.memory_space<vmem>>, %arg13: memref<1x32xf32, #tpu.memory_space<vmem>>, %arg14: memref<2x8x32xf32, #tpu.memory_space<vmem>>) attributes {dimension_semantics = [#tpu.dimension_semantics<parallel>, #tpu.dimension_semantics<parallel>], iteration_bounds = array<i64: 1, 1>, scalar_prefetch = 0 : i64, scratch_operands = 0 : i64, tpu.core_type = #tpu.core_type<tc>, window_params = [{transform_indices = @transform_0, window_bounds = array<i64: 2, 8, 32>}, {transform_indices = @transform_1, window_bounds = array<i64: 2, 8, 8>}, {transform_indices = @transform_2, window_bounds = array<i64: 2, 8, 8, 8>}, {transform_indices = @transform_3, window_bounds = array<i64: 2, 8, 8>}, {pipeline_mode = #tpu.pipeline_mode<synchronous>, transform_indices = @transform_4, window_bounds = array<i64: 32, 1>}, {pipeline_mode = #tpu.pipeline_mode<synchronous>, transform_indices = @transform_5, window_bounds = array<i64: 8, 1>}, {pipeline_mode = #tpu.pipeline_mode<synchronous>, transform_indices = @transform_6, window_bounds = array<i64: 8, 1>}, {pipeline_mode = #tpu.pipeline_mode<synchronous>, transform_indices = @transform_7, window_bounds = array<i64: 1, 32>}, {pipeline_mode = #tpu.pipeline_mode<synchronous>, transform_indices = @transform_8, window_bounds = array<i64: 8, 32>}, {pipeline_mode = #tpu.pipeline_mode<synchronous>, transform_indices = @transform_9, window_bounds = array<i64: 1, 32>}, {pipeline_mode = #tpu.pipeline_mode<synchronous>, transform_indices = @transform_10, window_bounds = array<i64: 8, 32>}, {pipeline_mode = #tpu.pipeline_mode<synchronous>, transform_indices = @transform_11, window_bounds = array<i64: 1, 32>}, {transform_indices = @transform_12, window_bounds = array<i64: 2, 8, 32>}]} {
    %c0 = arith.constant 0 : index
    %c0_0 = arith.constant 0 : index
    %c0_1 = arith.constant 0 : index
    %0 = vector.load %arg2[%c0, %c0_0, %c0_1] : memref<2x8x32xf32, #tpu.memory_space<vmem>>, vector<2x8x32xf32>
    %1 = vector.shape_cast %0 : vector<2x8x32xf32> to vector<16x32xf32>
    %c0_2 = arith.constant 0 : index
    %c0_3 = arith.constant 0 : index
    %c0_4 = arith.constant 0 : index
    %2 = vector.load %arg5[%c0_2, %c0_3, %c0_4] : memref<2x8x8xf32, #tpu.memory_space<vmem>>, vector<2x8x8xf32>
    %3 = vector.shape_cast %2 : vector<2x8x8xf32> to vector<16x8xf32>
    %c0_5 = arith.constant 0 : index
    %c0_6 = arith.constant 0 : index
    %c0_7 = arith.constant 0 : index
    %4 = vector.load %arg3[%c0_5, %c0_6, %c0_7] : memref<2x8x8xf32, #tpu.memory_space<vmem>>, vector<2x8x8xf32>
    %5 = vector.shape_cast %4 : vector<2x8x8xf32> to vector<16x8xf32>
    %c0_8 = arith.constant 0 : index
    %c0_9 = arith.constant 0 : index
    %c0_10 = arith.constant 0 : index
    %c0_11 = arith.constant 0 : index
    %6 = vector.load %arg4[%c0_8, %c0_9, %c0_10, %c0_11] : memref<2x8x8x8xf32, #tpu.memory_space<vmem>>, vector<2x8x8x8xf32>
    %7 = vector.shape_cast %6 : vector<2x8x8x8xf32> to vector<128x8xf32>
    %c0_12 = arith.constant 0 : index
    %c0_13 = arith.constant 0 : index
    %8 = vector.load %arg9[%c0_12, %c0_13] : memref<1x32xf32, #tpu.memory_space<vmem>>, vector<1x32xf32>
    %9 = vector.shape_cast %8 : vector<1x32xf32> to vector<1x1x32xf32>
    %cst = arith.constant dense<0.000000e+00> : vector<1xf32>
    %10 = vector.multi_reduction <add>, %9, %cst [1, 2] : vector<1x1x32xf32> to vector<1xf32>
    %11 = vector.shape_cast %10 : vector<1xf32> to vector<1x1x1xf32>
    %12 = vector.extract %11[0, 0, 0] : f32 from vector<1x1x1xf32>
    %13 = vector.broadcast %12 : f32 to vector<1x1xf32>
    %c0_14 = arith.constant 0 : index
    %c0_15 = arith.constant 0 : index
    %14 = vector.load %arg6[%c0_14, %c0_15] : memref<32x1xf32, #tpu.memory_space<vmem>>, vector<32x1xf32>
    %cst_16 = arith.constant dense<0.000000e+00> : vector<16x1xf32>
    %15 = tpu.matmul %1, %14, %cst_16 {dimension_numbers = #tpu.dot_dimension_numbers<[1], [0], [0], [1], [0, 0, 1, 1], [], []>} : vector<16x32xf32>, vector<32x1xf32>, vector<16x1xf32> -> vector<16x1xf32>
    %c0_17 = arith.constant 0 : index
    %c0_18 = arith.constant 0 : index
    %16 = vector.load %arg7[%c0_17, %c0_18] : memref<8x1xf32, #tpu.memory_space<vmem>>, vector<8x1xf32>
    %cst_19 = arith.constant dense<0.000000e+00> : vector<16x1xf32>
    %17 = tpu.matmul %3, %16, %cst_19 {dimension_numbers = #tpu.dot_dimension_numbers<[1], [0], [0], [1], [0, 0, 1, 1], [], []>} : vector<16x8xf32>, vector<8x1xf32>, vector<16x1xf32> -> vector<16x1xf32>
    %18 = arith.addf %15, %17 : vector<16x1xf32>
    %c0_20 = arith.constant 0 : index
    %c0_21 = arith.constant 0 : index
    %19 = vector.load %arg8[%c0_20, %c0_21] : memref<8x1xf32, #tpu.memory_space<vmem>>, vector<8x1xf32>
    %cst_22 = arith.constant dense<0.000000e+00> : vector<128x1xf32>
    %20 = tpu.matmul %7, %19, %cst_22 {dimension_numbers = #tpu.dot_dimension_numbers<[1], [0], [0], [1], [0, 0, 1, 1], [], []>} : vector<128x8xf32>, vector<8x1xf32>, vector<128x1xf32> -> vector<128x1xf32>
    %21 = vector.shape_cast %20 : vector<128x1xf32> to vector<16x8xf32>
    %22 = vector.broadcast %18 : vector<16x1xf32> to vector<16x8xf32>
    %23 = arith.addf %22, %21 : vector<16x8xf32>
    %24 = vector.broadcast %13 : vector<1x1xf32> to vector<16x8xf32>
    %25 = arith.addf %23, %24 : vector<16x8xf32>
    %cst_23 = arith.constant 0.000000e+00 : f32
    %26 = vector.broadcast %cst_23 : f32 to vector<16x8xf32>
    %27 = arith.cmpf oeq, %5, %26 : vector<16x8xf32>
    %cst_24 = arith.constant -1.000000e+30 : f32
    %cst_25 = arith.constant 0.000000e+00 : f32
    %28 = vector.broadcast %cst_24 : f32 to vector<16x8xf32>
    %29 = vector.broadcast %cst_25 : f32 to vector<16x8xf32>
    %30 = arith.select %27, %28, %29 : vector<16x8xi1>, vector<16x8xf32>
    %31 = arith.addf %25, %30 : vector<16x8xf32>
    %cst_26 = arith.constant dense<0xFF800000> : vector<16xf32>
    %32 = vector.multi_reduction <maximumf>, %31, %cst_26 [1] : vector<16x8xf32> to vector<16xf32>
    %33 = vector.shape_cast %32 : vector<16xf32> to vector<16x1xf32>
    %34 = vector.broadcast %33 : vector<16x1xf32> to vector<16x8xf32>
    %35 = arith.subf %31, %34 : vector<16x8xf32>
    %36 = math.exp %35 : vector<16x8xf32>
    %cst_27 = arith.constant dense<0.000000e+00> : vector<16xf32>
    %37 = vector.multi_reduction <add>, %36, %cst_27 [1] : vector<16x8xf32> to vector<16xf32>
    %38 = vector.shape_cast %37 : vector<16xf32> to vector<16x1xf32>
    %39 = tpu.reciprocal %38 {approx = true} : vector<16x1xf32> -> vector<16x1xf32>
    %40 = vector.broadcast %39 : vector<16x1xf32> to vector<16x8xf32>
    %41 = arith.mulf %36, %40 : vector<16x8xf32>
    %cst_28 = arith.constant dense<0.000000e+00> : vector<16xf32>
    %42 = vector.multi_reduction <add>, %41, %cst_28 [1] : vector<16x8xf32> to vector<16xf32>
    %43 = vector.shape_cast %42 : vector<16xf32> to vector<16x1xf32>
    %c0_29 = arith.constant 0 : index
    %c0_30 = arith.constant 0 : index
    %44 = vector.load %arg12[%c0_29, %c0_30] : memref<8x32xf32, #tpu.memory_space<vmem>>, vector<8x32xf32>
    %cst_31 = arith.constant dense<0.000000e+00> : vector<16x32xf32>
    %45 = tpu.matmul %3, %44, %cst_31 {dimension_numbers = #tpu.dot_dimension_numbers<[1], [0], [0], [1], [0, 0, 1, 1], [], []>} : vector<16x8xf32>, vector<8x32xf32>, vector<16x32xf32> -> vector<16x32xf32>
    %c0_32 = arith.constant 0 : index
    %c0_33 = arith.constant 0 : index
    %46 = vector.load %arg13[%c0_32, %c0_33] : memref<1x32xf32, #tpu.memory_space<vmem>>, vector<1x32xf32>
    %47 = vector.broadcast %46 : vector<1x32xf32> to vector<16x32xf32>
    %48 = arith.addf %45, %47 : vector<16x32xf32>
    %49 = vector.shape_cast %7 : vector<128x8xf32> to vector<16x8x8xf32>
    %50 = vector.shape_cast %41 : vector<16x8xf32> to vector<16x8x1xf32>
    %51 = vector.broadcast %50 : vector<16x8x1xf32> to vector<16x8x8xf32>
    %52 = arith.mulf %51, %49 : vector<16x8x8xf32>
    %cst_34 = arith.constant dense<0.000000e+00> : vector<16x8xf32>
    %53 = vector.multi_reduction <add>, %52, %cst_34 [1] : vector<16x8x8xf32> to vector<16x8xf32>
    %c0_35 = arith.constant 0 : index
    %c0_36 = arith.constant 0 : index
    %54 = vector.load %arg10[%c0_35, %c0_36] : memref<8x32xf32, #tpu.memory_space<vmem>>, vector<8x32xf32>
    %cst_37 = arith.constant dense<0.000000e+00> : vector<16x32xf32>
    %55 = tpu.matmul %53, %54, %cst_37 {dimension_numbers = #tpu.dot_dimension_numbers<[1], [0], [0], [1], [0, 0, 1, 1], [], []>} : vector<16x8xf32>, vector<8x32xf32>, vector<16x32xf32> -> vector<16x32xf32>
    %56 = arith.addf %1, %48 : vector<16x32xf32>
    %57 = vector.broadcast %43 : vector<16x1xf32> to vector<16x32xf32>
    %58 = arith.mulf %56, %57 : vector<16x32xf32>
    %59 = arith.addf %58, %55 : vector<16x32xf32>
    %c0_38 = arith.constant 0 : index
    %c0_39 = arith.constant 0 : index
    %60 = vector.load %arg11[%c0_38, %c0_39] : memref<1x32xf32, #tpu.memory_space<vmem>>, vector<1x32xf32>
    %61 = vector.broadcast %60 : vector<1x32xf32> to vector<16x32xf32>
    %62 = vector.broadcast %43 : vector<16x1xf32> to vector<16x32xf32>
    %63 = arith.mulf %61, %62 : vector<16x32xf32>
    %64 = arith.addf %59, %63 : vector<16x32xf32>
    %65 = vector.shape_cast %64 : vector<16x32xf32> to vector<2x8x32xf32>
    %c0_40 = arith.constant 0 : index
    %c0_41 = arith.constant 0 : index
    %c0_42 = arith.constant 0 : index
    %66 = vector.load %arg14[%c0_40, %c0_41, %c0_42] : memref<2x8x32xf32, #tpu.memory_space<vmem>>, vector<2x8x32xf32>
    tpu.vector_store %arg14[%c0_40, %c0_41, %c0_42], %65 {strides = array<i32>} : memref<2x8x32xf32, #tpu.memory_space<vmem>>, vector<2x8x32xf32>,
    return
  }
  func.func @transform_0(%arg0: i32, %arg1: i32) -> (i32, i32, i32) {
    %c0_i32 = arith.constant 0 : i32
    %c0_i32_0 = arith.constant 0 : i32
    return %arg0, %arg1, %c0_i32 : i32, i32, i32
  }
  func.func @transform_1(%arg0: i32, %arg1: i32) -> (i32, i32, i32) {
    %c0_i32 = arith.constant 0 : i32
    %c0_i32_0 = arith.constant 0 : i32
    return %arg0, %arg1, %c0_i32 : i32, i32, i32
  }
  func.func @transform_2(%arg0: i32, %arg1: i32) -> (i32, i32, i32, i32) {
    %c0_i32 = arith.constant 0 : i32
    %c0_i32_0 = arith.constant 0 : i32
    %c0_i32_1 = arith.constant 0 : i32
    return %arg0, %arg1, %c0_i32, %c0_i32_0 : i32, i32, i32, i32
  }
  func.func @transform_3(%arg0: i32, %arg1: i32) -> (i32, i32, i32) {
    %c0_i32 = arith.constant 0 : i32
    %c0_i32_0 = arith.constant 0 : i32
    return %arg0, %arg1, %c0_i32 : i32, i32, i32
  }
  func.func @transform_4(%arg0: i32, %arg1: i32) -> (i32, i32) {
    %c0_i32 = arith.constant 0 : i32
    %c0_i32_0 = arith.constant 0 : i32
    %c0_i32_1 = arith.constant 0 : i32
    return %c0_i32, %c0_i32_0 : i32, i32
  }
  func.func @transform_5(%arg0: i32, %arg1: i32) -> (i32, i32) {
    %c0_i32 = arith.constant 0 : i32
    %c0_i32_0 = arith.constant 0 : i32
    %c0_i32_1 = arith.constant 0 : i32
    return %c0_i32, %c0_i32_0 : i32, i32
  }
  func.func @transform_6(%arg0: i32, %arg1: i32) -> (i32, i32) {
    %c0_i32 = arith.constant 0 : i32
    %c0_i32_0 = arith.constant 0 : i32
    %c0_i32_1 = arith.constant 0 : i32
    return %c0_i32, %c0_i32_0 : i32, i32
  }
  func.func @transform_7(%arg0: i32, %arg1: i32) -> (i32, i32) {
    %c0_i32 = arith.constant 0 : i32
    %c0_i32_0 = arith.constant 0 : i32
    %c0_i32_1 = arith.constant 0 : i32
    return %c0_i32, %c0_i32_0 : i32, i32
  }
  func.func @transform_8(%arg0: i32, %arg1: i32) -> (i32, i32) {
    %c0_i32 = arith.constant 0 : i32
    %c0_i32_0 = arith.constant 0 : i32
    %c0_i32_1 = arith.constant 0 : i32
    return %c0_i32, %c0_i32_0 : i32, i32
  }
  func.func @transform_9(%arg0: i32, %arg1: i32) -> (i32, i32) {
    %c0_i32 = arith.constant 0 : i32
    %c0_i32_0 = arith.constant 0 : i32
    %c0_i32_1 = arith.constant 0 : i32
    return %c0_i32, %c0_i32_0 : i32, i32
  }
  func.func @transform_10(%arg0: i32, %arg1: i32) -> (i32, i32) {
    %c0_i32 = arith.constant 0 : i32
    %c0_i32_0 = arith.constant 0 : i32
    %c0_i32_1 = arith.constant 0 : i32
    return %c0_i32, %c0_i32_0 : i32, i32
  }
  func.func @transform_11(%arg0: i32, %arg1: i32) -> (i32, i32) {
    %c0_i32 = arith.constant 0 : i32
    %c0_i32_0 = arith.constant 0 : i32
    %c0_i32_1 = arith.constant 0 : i32
    return %c0_i32, %c0_i32_0 : i32, i32
  }
  func.func @transform_12(%arg0: i32, %arg1: i32) -> (i32, i32, i32) {
    %c0_i32 = arith.constant 0 : i32
    %c0_i32_0 = arith.constant 0 : i32
    return %arg0, %arg1, %c0_i32 : i32, i32, i32
  }
}

</mosaic_0001>

<bundles_post_ra>
// kernel: tpu_custom_call.1
= control target key start
LH: loop header
LB: loop body
LE: loop exit
PB: predicated region body
PF: predicated region fallthrough
CT: control target
= control target key end

     0   :  { %17 = vsyncpa [#allocation3], 0  ;;  %s1636_s0 = inlined_call_operand.vmem [shape: f32[2,8,32], index: 0, kind: input, shape index: {}]   ;;  %s1637_s1 = inlined_call_operand.vmem [shape: f32[2,8,8], index: 1, kind: input, shape index: {}]   ;;  %s1638_s2 = inlined_call_operand.hbm [shape: f32[2,8,8,8], index: 2, kind: input, shape index: {}]   ;;  %s1639_s3 = inlined_call_operand.vmem [shape: f32[2,8,8], index: 3, kind: input, shape index: {}]   ;;  %s1640_s4 = inlined_call_operand.vmem [shape: f32[32,1], index: 4, kind: input, shape index: {}]   ;;  %s1641_s5 = inlined_call_operand.vmem [shape: f32[8,1], index: 5, kind: input, shape index: {}]   ;;  %s1642_s6 = inlined_call_operand.vmem [shape: f32[8,1], index: 6, kind: input, shape index: {}]   ;;  %s1643_s7 = inlined_call_operand.vmem [shape: f32[1,32], index: 7, kind: input, shape index: {}]   ;;  %s1644_s8 = inlined_call_operand.vmem [shape: f32[8,32], index: 8, kind: input, shape index: {}]   ;;  %s1645_s9 = inlined_call_operand.vmem [shape: f32[1,32], index: 9, kind: input, shape index: {}]   ;;  %s1646_s10 = inlined_call_operand.vmem [shape: f32[8,32], index: 10, kind: input, shape index: {}]   ;;  %s1647_s11 = inlined_call_operand.vmem [shape: f32[1,32], index: 11, kind: input, shape index: {}]   ;;  %s1648_s12 = inlined_call_operand.hbm [shape: f32[2,8,32], index: 12, kind: output, shape index: {}]  }
   0x1   :  { %18 = vsyncpa [#allocation4], 0  ;;  %s1312_s21 = smov [#allocation2]   ;;  %s1264_s25 = scalar_lea.hbm %s1638_s2, 2048 }
   0x2   :  { %s28_s22 = sshll.u32 %s1312_s21, 4  ;;  %p1265_p0 = scmp.ne.s32.totalorder %s1638_s2, %s1264_s25  ;;  %s29_s22 = int_to_ptr.vmem [resolvable:$true] %s28_s22 }
   0x3   :  { %p1268_p1 = scmp.lt.u32.totalorder %s1264_s25, %s1638_s2 }
   0x5   :  { %p1270_p2 = pnand %p1268_p1, %p1265_p0 }
   0x7   :  { %1273 = shalt.err (!%p1270_p2)
}
   0x8   :  { %s1274_s30 = scalar_lea.vmem %s29_s22, 2048  ;;  %p1279_p4 = scmp.lt.s32.totalorder %s29_s22, %s29_s22 }
   0x9   :  { %p1275_p3 = scmp.ne.s32.totalorder %s29_s22, %s1274_s30  ;;  %p1280_p5 = scmp.lt.s32.totalorder %s1274_s30, %s1274_s30 }
   0xb   :  { %p1281_p6 = por %p1280_p5, %p1279_p4 }
   0xd   :  { %p1282_p7 = pnand %p1281_p6, %p1275_p3 }
   0xf   :  { %1285 = shalt.err (!%p1282_p7)
}
  0x10   :  { %s1313_s13 = smov 128   ;;  %s1314_s14 = smov 8  }
  0x11   :  { %34 = dma.hbm_to_vmem [thread:$0]  %s1638_s2, 2048, %s29_s22, [#allocation3], %s1313_s13, %s1313_s13, %s1314_s14  }
  0x12   :  { %1308 = dma.done.wait [#allocation3], 2048  }
  0x13   :  { %1309 = vsyncadd [#allocation3], 4294965248  ;;  %v1315_v0 = vmov 0   ;;  %vm95_vm0 = vcmask 64512   ;;  %v94_v1 = vld [vmem:[%s1641_s5] sm:$0xff]  ;;  %v1407_v4 = vld [vmem:[#allocation2 + $0x10] sm:$0xff]  ;;  %v527_v61 = vlaneseq }
  0x14   :  { %1254 = vset.pattern.permute.xlu1 %v1315_v0  ;;  %1255 = vset.pattern.permute.xlu0 %v1315_v0  ;;  %v259_v2 = vld [vmem:[%s1642_s6] sm:$0xff]  ;;  %v1412_v5 = vld [vmem:[%s1639_s3 + $0x8] sm:$0xff]  ;;  %v1421_v8 = vld [vmem:[#allocation2 + $0x18] sm:$0xff]  ;;  %vm177_vm1 = vcmask 261120   ;;  %vm79_vm2 = vcmask 253952   ;;  %vm593_vm3 = vcmask 1041409  }
  0x15   :  { %v58_v3 = vld [vmem:[%s1639_s3] sm:$0xff]  ;;  %1182 = vmatprep.subr.mxu0 %v94_v1  ;;  %1242 = vmatprep.subr.mxu1 %v259_v2  ;;  %v91_v7 = vld [vmem:[%s1640_s4 + $0x8] sm:$0xff]  ;;  %v92_v11 = vld [vmem:[%s1640_s4 + $0x10] sm:$0xff]  ;;  %v528_v63 = vand.u32 127, %v527_v61  ;;  %v1509_v0 = vshrl.u32 %v527_v61, 7  ;;  %vm595_vm4 = vcmask 1042434  }
  0x16   :  { %v90_v6 = vld [vmem:[%s1640_s4] sm:$0xff]  ;;  %1183 = vmatpush3.msra.mxu0 %v94_v1  ;;  %1184 = vmatprep.mubr.msk.f32.mxu0 %vm95_vm0, %v58_v3  ;;  %v93_v12 = vld [vmem:[%s1640_s4 + $0x18] sm:$0xff]  ;;  %v1444_v15 = vld [vmem:[#allocation2 + $0x28] sm:$0xff]  ;;  %vm597_vm5 = vcmask 1043459   ;;  %vm599_vm6 = vcmask 1044484   ;;  %vm601_vm7 = vcmask 1045509  }
  0x17   :  { %v1423_v9 = vld [vmem:[#allocation2 + $0x20] sm:$0xff]  ;;  %1243 = vmatpush3.msra.mxu1 %v259_v2  ;;  %1203 = vmatprep.mubr.msk.f32.mxu1 %vm95_vm0, %v1407_v4  ;;  %v1234_v10 = vpack.c.bf16 %v91_v7, %v90_v6  ;;  %v1238_v13 = vpack.c.bf16 %v93_v12, %v92_v11  ;;  %v1448_v16 = vld [vmem:[#allocation2 + $0x30] sm:$0xff]  ;;  %v1457_v18 = vld [vmem:[#allocation2 + $0x38] sm:$0xff]  ;;  %vm603_vm8 = vcmask 1046534   ;;  %vm605_vm9 = vcmask 1047559  }
  0x18   :  { %1185 = vmatmul.mubr.msk.f32.vlgmr.msra.gmra.mrb[0].mxu0 %vm95_vm0, %v1412_v5  ;;  %1204 = vmatmul.mubr.msk.f32.vlgmr.msra.gmra.mrb[0].mxu1 %vm95_vm0, %v1421_v8  ;;  %v1440_v14 = vld [vmem:[%s1636_s0] sm:$0xff]  ;;  %v1462_v20 = vld [vmem:[%s1636_s0 + $0x8] sm:$0xff]  ;;  %v1480_v25 = vld [vmem:[#allocation2 + $0x50] sm:$0xff] }
  0x19   :  { %1235 = vmatprep.subr.bf16.mxu0 %v1234_v10  ;;  %1206 = vmatprep.mubr.msk.f32.mxu1 %vm95_vm0, %v1423_v9  ;;  %v78_v17 = vld [vmem:[%s1643_s7] sm:$0x1]  ;;  %v1474_v23 = vld [vmem:[#allocation2 + $0x48] sm:$0xff]  ;;  %v1488_v26 = vld [vmem:[#allocation2 + $0x58] sm:$0xff] }
  0x1a   :  { %1237 = vmatpush3.bf16.msra.mxu0 %v1234_v10  ;;  %1195 = vmatprep.mubr.msk.f32.mxu0 %vm177_vm1, %v1440_v14  ;;  %v80_v19 = vsel %vm79_vm2, %v78_v17, 0.0  ;;  %v1464_v21 = vld [vmem:[#allocation2 + $0x40] sm:$0xff]  ;;  %v1478_v24 = vld [vmem:[#allocation2 + $0x8] sm:$0xff]  ;;  %v1499_v29 = vld [vmem:[#allocation2 + $0x70] sm:$0xff] }
  0x1b   :  { %1239 = vmatprep.subr.bf16.mxu0 %v1238_v13  ;;  %81 = vadd.xlane.f32.xlu0 %v80_v19  ;;  %v1466_v22 = vld [vmem:[#allocation2] sm:$0xff]  ;;  %v1497_v28 = vld [vmem:[#allocation2 + $0x68] sm:$0xff]  ;;  %v1505_v30 = vld [vmem:[#allocation2 + $0x78] sm:$0xff] }
  0x1c   :  { %1207 = vmatmul.mubr.msk.f32.gmra.mrb[2].mxu1 %vm95_vm0, %v1444_v15  ;;  %v1490_v27 = vld [vmem:[#allocation2 + $0x60] sm:$0xff] }
  0x1d   :  { %1209 = vmatprep.mubr.msk.f32.mxu1 %vm95_vm0, %v1448_v16 }
  0x1e   :  { %1241 = vmatpush3.bf16.msra.mxu0 %v1238_v13 }
  0x1f   :  { %1198 = vmatprep.subr.mxu0 %v259_v2 }
  0x20   :  { %1210 = vmatmul.mubr.msk.f32.gmra.mrb[4].mxu1 %vm95_vm0, %v1457_v18 }
  0x21   :  { %1196 = vmatmul.mubr.msk.f32.vlgmr.msra.gmra.mrb[0].mxu0 %vm177_vm1, %v1462_v20  ;;  %1212 = vmatprep.mubr.msk.f32.mxu1 %vm95_vm0, %v1464_v21 }
  0x22   :  { %1199 = vmatpush3.msra.mxu0 %v259_v2  ;;  %1200 = vmatprep.mubr.msk.f32.mxu0 %vm95_vm0, %v1466_v22  ;;  %v531_v2 = vsub.s32 %v528_v63, %v1509_v0 }
  0x24   :  { %1213 = vmatmul.mubr.msk.f32.gmra.mrb[6].mxu1 %vm95_vm0, %v1474_v23 }
  0x25   :  { %1201 = vmatmul.mubr.msk.f32.vlgmr.msra.gmra.mrb[2].mxu0 %vm95_vm0, %v1478_v24  ;;  %1215 = vmatprep.mubr.msk.f32.mxu1 %vm95_vm0, %v1480_v25 }
  0x26   :  { %1226 = vmatprep.mubr.msk.f32.mxu0 %vm95_vm0, %v58_v3 }
  0x28   :  { %1216 = vmatmul.mubr.msk.f32.gmra.mrb[8].mxu1 %vm95_vm0, %v1488_v26 }
  0x29   :  { %1218 = vmatprep.mubr.msk.f32.mxu1 %vm95_vm0, %v1490_v27 }
  0x2c   :  { %1219 = vmatmul.mubr.msk.f32.gmra.mrb[10].mxu1 %vm95_vm0, %v1497_v28 }
  0x2d   :  { %1221 = vmatprep.mubr.msk.f32.mxu1 %vm95_vm0, %v1499_v29 }
  0x30   :  { %1222 = vmatmul.mubr.msk.f32.gmra.mrb[12].mxu1 %vm95_vm0, %v1505_v30 }
  0xa8   :  { %v82_v31 = vpop.xlane.xlu0 %81 }
  0xa9   :  { %v83_v32 = vrot.slane %v82_v31, 4 }
  0xab   :  { %v84_v33 = vadd.f32 %v83_v32, %v82_v31 }
  0xad   :  { %v85_v34 = vrot.slane %v84_v33, 2 }
  0xaf   :  { %v86_v35 = vadd.f32 %v85_v34, %v84_v33 }
  0xb1   :  { %v87_v36 = vrot.slane %v86_v35, 1 }
  0xb3   :  { %v88_v37 = vadd.f32 %v87_v36, %v86_v35 }
  0xb5   :  { %1246 = vpush %v88_v37 }
  0xe6   :  { %s1247_s20 = spop %1246 }
  0xeb   :  { %v1205_v38 = vpop.f32.mrb[0].mxu1 }
  0xec   :  { %489 = vperm.xlu1 %1254, %v1205_v38   ;;  %v384_v39 = vpop.f32.mrb[1].mxu1 }
  0xef   :  { %v1208_v40 = vpop.f32.mrb[2].mxu1 }
  0xf0   :  { %486 = vperm.xlu1 %1254, %v384_v39   ;;  %v394_v41 = vpop.f32.mrb[3].mxu1 }
  0xf3   :  { %v1211_v42 = vpop.f32.mrb[4].mxu1 }
  0xf4   :  { %v1197_v43 = vpop.f32.mrb[0].mxu0  ;;  %495 = vperm.xlu1 %1254, %v1208_v40   ;;  %v404_v44 = vpop.f32.mrb[5].mxu1 }
  0xf5   :  { %v250_v45 = vpop.f32.mrb[1].mxu0 }
  0xf7   :  { %v1214_v46 = vpop.f32.mrb[6].mxu1 }
  0xf8   :  { %v1202_v47 = vpop.f32.mrb[2].mxu0  ;;  %492 = vperm.xlu1 %1254, %v394_v41   ;;  %v414_v48 = vpop.f32.mrb[7].mxu1 }
  0xf9   :  { %v374_v49 = vpop.f32.mrb[3].mxu0 }
  0xfa   :  { %480 = vperm.xlu0 %1255, %v374_v49  }
  0xfb   :  { %v1217_v50 = vpop.f32.mrb[8].mxu1 }
  0xfc   :  { %498 = vperm.xlu1 %1254, %v404_v44   ;;  %v424_v51 = vpop.f32.mrb[9].mxu1 }
  0xfe   :  { %501 = vperm.xlu0 %1255, %v1211_v42  }
  0xff   :  { %v1220_v52 = vpop.f32.mrb[10].mxu1 }
 0x100   :  { %483 = vperm.xlu1 %1254, %v1202_v47   ;;  %v434_v53 = vpop.f32.mrb[11].mxu1 }
 0x103   :  { %v1223_v54 = vpop.f32.mrb[12].mxu1 }
 0x104   :  { %507 = vperm.xlu1 %1254, %v1214_v46   ;;  %525 = vperm.xlu0 %1255, %v1223_v54   ;;  %v444_v55 = vpop.f32.mrb[13].mxu1  ;;  %v61_v54 = vld [vmem:[%s1637_s1 + $0x8] sm:$0xff] }
 0x105   :  { %vm622_vm11 = vcmp.eq.f32.partialorder %v61_v54, 0.0 }
 0x108   :  { %504 = vperm.xlu1 %1254, %v414_v48   ;;  %460 = vperm.xlu0 %1255, %v1197_v43  }
 0x10c   :  { %513 = vperm.xlu1 %1254, %v1217_v50  }
 0x110   :  { %510 = vperm.xlu1 %1254, %v424_v51  }
 0x114   :  { %519 = vperm.xlu1 %1254, %v1220_v52  }
 0x118   :  { %516 = vperm.xlu1 %1254, %v434_v53   ;;  %v60_v53 = vld [vmem:[%s1637_s1] sm:$0xff] }
 0x119   :  { %vm621_vm10 = vcmp.eq.f32.partialorder %v60_v53, 0.0 }
 0x11c   :  { %522 = vperm.xlu1 %1254, %v444_v55  }
 0x120   :  { %455 = vperm.xlu1 %1254, %v250_v45  }
 0x16b   :  { %v490_v56 = vpop.permute.xlu1 %489 }
 0x16c   :  { %v544_v31 = vrot.slane %v490_v56, %v531_v2 }
 0x16f   :  { %v487_v57 = vpop.permute.xlu1 %486 }
 0x170   :  { %v540_v13 = vrot.slane %v487_v57, %v531_v2 }
 0x173   :  { %v496_v58 = vpop.permute.xlu1 %495 }
 0x174   :  { %v552_v42 = vrot.slane %v496_v58, %v531_v2 }
 0x177   :  { %v493_v59 = vpop.permute.xlu1 %492 }
 0x178   :  { %v548_v37 = vrot.slane %v493_v59, %v531_v2 }
 0x179   :  { %v481_v6 = vpop.permute.xlu0 %480 }
 0x17a   :  { %v532_v7 = vrot.slane %v481_v6, %v531_v2 }
 0x17b   :  { %v499_v60 = vpop.permute.xlu1 %498 }
 0x17c   :  { %v556_v49 = vrot.slane %v499_v60, %v531_v2 }
 0x17d   :  { %v502_v38 = vpop.permute.xlu0 %501 }
 0x17e   :  { %v560_v57 = vrot.slane %v502_v38, %v531_v2 }
 0x17f   :  { %v484_v62 = vpop.permute.xlu1 %483 }
 0x180   :  { %v536_v10 = vrot.slane %v484_v62, %v531_v2 }
 0x182   :  { %v594_v12 = vsel %vm593_vm3, %v536_v10, %v532_v7  ;;  %v618_v7 = vstv %s1247_s20  ;;  %v1316_v10 = vmov 0.0  }
 0x183   :  { %v508_v1 = vpop.permute.xlu1 %507  ;;  %v596_v19 = vsel %vm595_vm4, %v540_v13, %v594_v12  ;;  %v526_v46 = vpop.permute.xlu0 %525  ;;  %v624_v12 = vsel %vm622_vm11, -1e+30, %v1316_v10 }
 0x184   :  { %v598_v34 = vsel %vm597_vm5, %v544_v31, %v596_v19  ;;  %v568_v35 = vrot.slane %v508_v1, %v531_v2  ;;  %v592_v58 = vrot.slane %v526_v46, %v531_v2  ;;  %v740_v46 = vsub.s32 0, %v1509_v0 }
 0x185   :  { %v600_v41 = vsel %vm599_vm6, %v548_v37, %v598_v34 }
 0x186   :  { %v602_v48 = vsel %vm601_vm7, %v552_v42, %v600_v41 }
 0x187   :  { %v505_v3 = vpop.permute.xlu1 %504  ;;  %v604_v56 = vsel %vm603_vm8, %v556_v49, %v602_v48  ;;  %v461_v61 = vpop.permute.xlu0 %460 }
 0x188   :  { %v564_v32 = vrot.slane %v505_v3, %v531_v2  ;;  %v606_v63 = vsel %vm605_vm9, %v560_v57, %v604_v56  ;;  %v768_v57 = vsub.s32 4, %v1509_v0 }
 0x18a   :  { %v607_v39 = vsel %vm593_vm3, %v568_v35, %v564_v32 }
 0x18b   :  { %v514_v11 = vpop.permute.xlu1 %513 }
 0x18c   :  { %v576_v43 = vrot.slane %v514_v11, %v531_v2  ;;  %v623_v11 = vsel %vm621_vm10, -1e+30, %v1316_v10  ;;  %v789_v10 = vsub.s32 7, %v1509_v0 }
 0x18f   :  { %v511_v17 = vpop.permute.xlu1 %510 }
 0x190   :  { %v572_v33 = vrot.slane %v511_v17, %v531_v2 }
 0x192   :  { %v608_v40 = vsel %vm595_vm4, %v572_v33, %v607_v39  ;;  %v655_v33 = vld [vmem:[%s1646_s10] sm:$0xff] }
 0x193   :  { %v520_v36 = vpop.permute.xlu1 %519  ;;  %v609_v47 = vsel %vm597_vm5, %v576_v43, %v608_v40  ;;  %1224 = vmatprep.subr.mxu0 %v655_v33 }
 0x194   :  { %v584_v51 = vrot.slane %v520_v36, %v531_v2  ;;  %1225 = vmatpush3.msra.mxu0 %v655_v33 }
 0x195   :  { %1227 = vmatmul.mubr.msk.f32.vlgmr.msra.gmra.mrb[4].mxu0 %vm95_vm0, %v1412_v5  ;;  %v747_v5 = vsub.s32 1, %v1509_v0 }
 0x197   :  { %v517_v44 = vpop.permute.xlu1 %516 }
 0x198   :  { %v580_v45 = vrot.slane %v517_v44, %v531_v2 }
 0x19a   :  { %v610_v50 = vsel %vm599_vm6, %v580_v45, %v609_v47 }
 0x19b   :  { %v523_v52 = vpop.permute.xlu1 %522  ;;  %v611_v59 = vsel %vm601_vm7, %v584_v51, %v610_v50  ;;  %v754_v51 = vsub.s32 2, %v1509_v0 }
 0x19c   :  { %v588_v55 = vrot.slane %v523_v52, %v531_v2  ;;  %v761_v52 = vsub.s32 3, %v1509_v0 }
 0x19e   :  { %v612_v60 = vsel %vm603_vm8, %v588_v55, %v611_v59 }
 0x19f   :  { %v456_v62 = vpop.permute.xlu1 %455  ;;  %v613_v1 = vsel %vm605_vm9, %v592_v58, %v612_v60  ;;  %v775_v60 = vsub.s32 5, %v1509_v0 }
 0x1a0   :  { %v616_v3 = vadd.f32 %v606_v63, %v456_v62  ;;  %v617_v6 = vadd.f32 %v613_v1, %v461_v61  ;;  %v782_v63 = vsub.s32 6, %v1509_v0 }
 0x1a2   :  { %v619_v2 = vadd.f32 %v618_v7, %v616_v3  ;;  %v620_v13 = vadd.f32 %v618_v7, %v617_v6 }
 0x1a4   :  { %v625_v17 = vadd.f32 %v623_v11, %v619_v2  ;;  %v626_v19 = vadd.f32 %v624_v12, %v620_v13 }
 0x1a6   :  { %v627_v31 = vsel %vm95_vm0, %v625_v17, -inf  ;;  %v630_v32 = vsel %vm95_vm0, %v626_v19, -inf }
 0x1a7   :  { %628 = vmax.xlane.f32.xlu1 %v627_v31  ;;  %631 = vmax.xlane.f32.xlu0 %v630_v32 }
 0x234   :  { %v629_v34 = vpop.xlane.xlu1 %628  ;;  %v632_v35 = vpop.xlane.xlu0 %631 }
 0x235   :  { %v633_v36 = vsub.f32 %v625_v17, %v629_v34  ;;  %v634_v37 = vsub.f32 %v626_v19, %v632_v35  ;;  %v978_v17 = vld [vmem:[%s1644_s8] sm:$0xff] }
 0x236   :  { %1229 = vmatprep.subr.mxu0 %v978_v17 }
 0x237   :  { %v635_v38 = vmul.f32 1.442695, %v633_v36  ;;  %v637_v39 = vmul.f32 1.442695, %v634_v37  ;;  %1230 = vmatpush3.msra.mxu0 %v978_v17 }
 0x239   :  { %1256 = vpow2.f32 %v635_v38 }
 0x23a   :  { %1258 = vpow2.f32 %v637_v39 }
 0x243   :  { %v1257_v40 = vpop.eup %1256 }
 0x244   :  { %v1259_v41 = vpop.eup %1258  ;;  %v639_v42 = vsel %vm95_vm0, %v1257_v40, 0.0 }
 0x245   :  { %640 = vadd.xlane.f32.xlu0 %v639_v42  ;;  %v642_v43 = vsel %vm95_vm0, %v1259_v41, 0.0 }
 0x246   :  { %643 = vadd.xlane.f32.xlu1 %v642_v43 }
 0x268   :  { %v1552_v19 = vpop.f32.mrb[4].mxu0 }
 0x269   :  { %v1556_v32 = vpop.f32.mrb[5].mxu0 }
 0x2d2   :  { %v641_v44 = vpop.xlane.xlu0 %640 }
 0x2d3   :  { %1260 = vrcp.f32 %v641_v44  ;;  %v644_v45 = vpop.xlane.xlu1 %643 }
 0x2d4   :  { %1262 = vrcp.f32 %v644_v45 }
 0x2dd   :  { %v1261_v47 = vpop.eup %1260 }
 0x2de   :  { %v647_v48 = vmul.f32 %v1261_v47, %v1257_v40  ;;  %v1263_v53 = vpop.eup %1262 }
 0x2df   :  { %v648_v54 = vmul.f32 %v1263_v53, %v1259_v41 }
 0x2e0   :  { %v748_v49 = vrot.slane %v647_v48, %v747_v5  ;;  %v741_v50 = vrot.slane %v647_v48, %v740_v46  ;;  %v755_v55 = vrot.slane %v647_v48, %v754_v51  ;;  %v762_v56 = vrot.slane %v647_v48, %v761_v52 }
 0x2e1   :  { %v804_v58 = vrot.slane %v648_v54, %v747_v5  ;;  %v769_v59 = vrot.slane %v647_v48, %v768_v57  ;;  %v811_v61 = vrot.slane %v648_v54, %v754_v51  ;;  %v776_v62 = vrot.slane %v647_v48, %v775_v60 }
 0x2e2   :  { %750 = vbcast.lane.b32.xlu1 %v748_v49, 256  ;;  %743 = vbcast.lane.b32.xlu0 %v741_v50, 256  ;;  %v818_v1 = vrot.slane %v648_v54, %v761_v52  ;;  %v783_v3 = vrot.slane %v647_v48, %v782_v63  ;;  %v825_v6 = vrot.slane %v648_v54, %v768_v57  ;;  %v652_v0 = vsel %vm95_vm0, %v648_v54, 0.0 }
 0x2e3   :  { %v797_v7 = vrot.slane %v648_v54, %v740_v46  ;;  %v832_v11 = vrot.slane %v648_v54, %v775_v60  ;;  %v790_v12 = vrot.slane %v647_v48, %v789_v10  ;;  %v839_v2 = vrot.slane %v648_v54, %v782_v63 }
 0x2e4   :  { %v846_v13 = vrot.slane %v648_v54, %v789_v10  ;;  %v649_v31 = vsel %vm95_vm0, %v647_v48, 0.0 }
 0x2e6   :  { %757 = vbcast.lane.b32.xlu1 %v755_v55, 256  ;;  %764 = vbcast.lane.b32.xlu0 %v762_v56, 256 }
 0x2ea   :  { %806 = vbcast.lane.b32.xlu1 %v804_v58, 256  ;;  %771 = vbcast.lane.b32.xlu0 %v769_v59, 256 }
 0x2ee   :  { %813 = vbcast.lane.b32.xlu1 %v811_v61, 256  ;;  %778 = vbcast.lane.b32.xlu0 %v776_v62, 256 }
 0x2f2   :  { %820 = vbcast.lane.b32.xlu1 %v818_v1, 256  ;;  %785 = vbcast.lane.b32.xlu0 %v783_v3, 256 }
 0x2f6   :  { %827 = vbcast.lane.b32.xlu1 %v825_v6, 256  ;;  %799 = vbcast.lane.b32.xlu0 %v797_v7, 256 }
 0x2fa   :  { %834 = vbcast.lane.b32.xlu1 %v832_v11, 256  ;;  %792 = vbcast.lane.b32.xlu0 %v790_v12, 256 }
 0x2fe   :  { %841 = vbcast.lane.b32.xlu1 %v839_v2, 256  ;;  %848 = vbcast.lane.b32.xlu0 %v846_v13, 256 }
 0x31d   :  { %653 = vadd.xlane.f32.xlu0 %v652_v0 }
 0x322   :  { %650 = vadd.xlane.f32.xlu1 %v649_v31 }
 0x354   :  { %v751_v33 = vpop.permute.xlu1 %750  ;;  %v744_v34 = vpop.permute.xlu0 %743 }
 0x355   :  { %v851_v35 = vmul.f32 %v751_v33, %v1478_v24  ;;  %v850_v36 = vmul.f32 %v744_v34, %v1466_v22 }
 0x357   :  { %v873_v37 = vsel %vm95_vm0, %v851_v35, 0.0  ;;  %v866_v38 = vsel %vm95_vm0, %v850_v36, 0.0 }
 0x358   :  { %v874_v39 = vrot.slane %v873_v37, 4  ;;  %v867_v40 = vrot.slane %v866_v38, 4  ;;  %v758_v41 = vpop.permute.xlu1 %757  ;;  %v765_v42 = vpop.permute.xlu0 %764 }
 0x359   :  { %v852_v43 = vmul.f32 %v758_v41, %v1407_v4  ;;  %v853_v44 = vmul.f32 %v765_v42, %v1421_v8 }
 0x35a   :  { %v875_v45 = vadd.f32 %v874_v39, %v873_v37  ;;  %v868_v5 = vadd.f32 %v867_v40, %v866_v38 }
 0x35b   :  { %v880_v46 = vsel %vm95_vm0, %v852_v43, 0.0  ;;  %v887_v24 = vsel %vm95_vm0, %v853_v44, 0.0 }
 0x35c   :  { %v876_v47 = vrot.slane %v875_v45, 2  ;;  %v869_v22 = vrot.slane %v868_v5, 2  ;;  %v881_v48 = vrot.slane %v880_v46, 4  ;;  %v888_v49 = vrot.slane %v887_v24, 4  ;;  %v807_v50 = vpop.permute.xlu1 %806  ;;  %v772_v51 = vpop.permute.xlu0 %771 }
 0x35d   :  { %v859_v52 = vmul.f32 %v807_v50, %v1474_v23  ;;  %v854_v53 = vmul.f32 %v772_v51, %v1423_v9 }
 0x35e   :  { %v877_v54 = vadd.f32 %v876_v47, %v875_v45  ;;  %v870_v4 = vadd.f32 %v869_v22, %v868_v5  ;;  %v882_v55 = vadd.f32 %v881_v48, %v880_v46  ;;  %v889_v8 = vadd.f32 %v888_v49, %v887_v24 }
 0x35f   :  { %v929_v56 = vsel %vm95_vm0, %v859_v52, 0.0  ;;  %v894_v57 = vsel %vm95_vm0, %v854_v53, 0.0 }
 0x360   :  { %v878_v58 = vrot.slane %v877_v54, 1  ;;  %v871_v59 = vrot.slane %v870_v4, 1  ;;  %v883_v60 = vrot.slane %v882_v55, 2  ;;  %v890_v61 = vrot.slane %v889_v8, 2  ;;  %v814_v62 = vpop.permute.xlu1 %813  ;;  %v779_v63 = vpop.permute.xlu0 %778 }
 0x361   :  { %v930_v1 = vrot.slane %v929_v56, 4  ;;  %v895_v3 = vrot.slane %v894_v57, 4  ;;  %v860_v23 = vmul.f32 %v814_v62, %v1480_v25  ;;  %v855_v9 = vmul.f32 %v779_v63, %v1444_v15 }
 0x362   :  { %v884_v6 = vadd.f32 %v883_v60, %v882_v55  ;;  %v891_v7 = vadd.f32 %v890_v61, %v889_v8  ;;  %v879_v10 = vadd.f32 %v878_v58, %v877_v54  ;;  %v872_v13 = vadd.f32 %v871_v59, %v870_v4 }
 0x363   :  { %v931_v11 = vadd.f32 %v930_v1, %v929_v56  ;;  %v936_v12 = vsel %vm95_vm0, %v860_v23, 0.0  ;;  %v901_v2 = vsel %vm95_vm0, %v855_v9, 0.0  ;;  %v896_v0 = vadd.f32 %v895_v3, %v894_v57 }
 0x364   :  { %v885_v17 = vrot.slane %v884_v6, 1  ;;  %v937_v31 = vrot.slane %v936_v12, 4  ;;  %v821_v33 = vpop.permute.xlu1 %820  ;;  %v786_v34 = vpop.permute.xlu0 %785  ;;  %v892_v35 = vrot.slane %v891_v7, 1  ;;  %v902_v37 = vrot.slane %v901_v2, 4 }
 0x365   :  { %v932_v36 = vrot.slane %v931_v11, 2  ;;  %v861_v25 = vmul.f32 %v821_v33, %v1488_v26  ;;  %v856_v39 = vmul.f32 %v786_v34, %v1448_v16  ;;  %v995_v42 = vsel %vm593_vm3, %v879_v10, %v872_v13 }
 0x366   :  { %v886_v15 = vadd.f32 %v885_v17, %v884_v6  ;;  %v938_v38 = vadd.f32 %v937_v31, %v936_v12  ;;  %v903_v40 = vadd.f32 %v902_v37, %v901_v2  ;;  %v897_v43 = vrot.slane %v896_v0, 2 }
 0x367   :  { %v943_v41 = vsel %vm95_vm0, %v861_v25, 0.0  ;;  %v908_v45 = vsel %vm95_vm0, %v856_v39, 0.0  ;;  %v893_v47 = vadd.f32 %v892_v35, %v891_v7  ;;  %v933_v22 = vadd.f32 %v932_v36, %v931_v11 }
 0x368   :  { %v944_v44 = vrot.slane %v943_v41, 4  ;;  %v828_v5 = vpop.permute.xlu1 %827  ;;  %v800_v46 = vpop.permute.xlu0 %799  ;;  %v996_v24 = vsel %vm595_vm4, %v886_v15, %v995_v42  ;;  %v939_v26 = vrot.slane %v938_v38, 2  ;;  %v909_v49 = vrot.slane %v908_v45, 4 }
 0x369   :  { %v862_v16 = vmul.f32 %v828_v5, %v1490_v27  ;;  %v904_v50 = vrot.slane %v903_v40, 2  ;;  %v858_v51 = vmul.f32 %v800_v46, %v1464_v21  ;;  %v898_v52 = vadd.f32 %v897_v43, %v896_v0 }
 0x36a   :  { %v945_v48 = vadd.f32 %v944_v44, %v943_v41  ;;  %v910_v54 = vadd.f32 %v909_v49, %v908_v45  ;;  %v1584_v56 = vsel %vm597_vm5, %v893_v47, %v996_v24  ;;  %v934_v60 = vrot.slane %v933_v22, 1 }
 0x36b   :  { %v950_v4 = vsel %vm95_vm0, %v862_v16, 0.0  ;;  %v922_v58 = vsel %vm95_vm0, %v858_v51, 0.0  ;;  %v940_v27 = vadd.f32 %v939_v26, %v938_v38  ;;  %v905_v21 = vadd.f32 %v904_v50, %v903_v40 }
 0x36c   :  { %v946_v53 = vrot.slane %v945_v48, 2  ;;  %v835_v55 = vpop.permute.xlu1 %834  ;;  %v793_v8 = vpop.permute.xlu0 %792  ;;  %v951_v57 = vrot.slane %v950_v4, 4  ;;  %v911_v61 = vrot.slane %v910_v54, 2  ;;  %v923_v62 = vrot.slane %v922_v58, 4 }
 0x36d   :  { %v863_v59 = vmul.f32 %v835_v55, %v1497_v28  ;;  %v857_v3 = vmul.f32 %v793_v8, %v1457_v18  ;;  %v899_v17 = vrot.slane %v898_v52, 1  ;;  %v941_v0 = vrot.slane %v940_v27, 1 }
 0x36e   :  { %v952_v63 = vadd.f32 %v951_v57, %v950_v4  ;;  %v947_v23 = vadd.f32 %v946_v53, %v945_v48  ;;  %v912_v9 = vadd.f32 %v911_v61, %v910_v54  ;;  %v924_v6 = vadd.f32 %v923_v62, %v922_v58 }
 0x36f   :  { %v957_v1 = vsel %vm95_vm0, %v863_v59, 0.0  ;;  %v915_v2 = vsel %vm95_vm0, %v857_v3, 0.0  ;;  %v906_v37 = vrot.slane %v905_v21, 1  ;;  %v935_v45 = vadd.f32 %v934_v60, %v933_v22 }
 0x370   :  { %v958_v7 = vrot.slane %v957_v1, 4  ;;  %v842_v10 = vpop.permute.xlu1 %841  ;;  %v849_v11 = vpop.permute.xlu0 %848  ;;  %v953_v12 = vrot.slane %v952_v63, 2  ;;  %v925_v31 = vrot.slane %v924_v6, 2  ;;  %v916_v35 = vrot.slane %v915_v2, 4 }
 0x371   :  { %v864_v28 = vmul.f32 %v842_v10, %v1499_v29  ;;  %v865_v13 = vmul.f32 %v849_v11, %v1505_v30  ;;  %v948_v39 = vrot.slane %v947_v23, 1  ;;  %v913_v40 = vrot.slane %v912_v9, 1  ;;  %v1144_v10 = vld [vmem:[%s1647_s11] ss:$0 sm:$0xff]  ;;  %s1317_s11 = smov [#allocation5]  }
 0x372   :  { %v959_v33 = vadd.f32 %v958_v7, %v957_v1  ;;  %v954_v34 = vadd.f32 %v953_v12, %v952_v63  ;;  %v926_v25 = vadd.f32 %v925_v31, %v924_v6  ;;  %v917_v41 = vadd.f32 %v916_v35, %v915_v2  ;;  %s1112_s25 = sshll.u32 %s1317_s11, 4  ;;  %s1113_s25 = int_to_ptr.vmem [resolvable:$true] %s1112_s25 }
 0x373   :  { %v964_v18 = vsel %vm95_vm0, %v864_v28, 0.0  ;;  %v971_v36 = vsel %vm95_vm0, %v865_v13, 0.0  ;;  %v900_v5 = vadd.f32 %v899_v17, %v898_v52  ;;  %v942_v47 = vadd.f32 %v941_v0, %v940_v27  ;;  %v1149_v0 = vld [vmem:[%s1645_s9] ss:$0 sm:$0xff]  ;;  %s1286_s5 = scalar_lea.vmem %s1113_s25, 256  ;;  %p1291_p9 = scmp.lt.s32.totalorder %s1113_s25, %s1113_s25 }
 0x374   :  { %v960_v15 = vrot.slane %v959_v33, 2  ;;  %v965_v38 = vrot.slane %v964_v18, 4  ;;  %v972_v29 = vrot.slane %v971_v36, 4  ;;  %v955_v42 = vrot.slane %v954_v34, 1  ;;  %p1287_p8 = scmp.ne.s32.totalorder %s1113_s25, %s1286_s5  ;;  %p1292_p10 = scmp.lt.s32.totalorder %s1286_s5, %s1286_s5 }
 0x375   :  { %v927_v30 = vrot.slane %v926_v25, 1  ;;  %v918_v46 = vrot.slane %v917_v41, 2  ;;  %v907_v16 = vadd.f32 %v906_v37, %v905_v21  ;;  %v949_v50 = vadd.f32 %v948_v39, %v947_v23 }
 0x376   :  { %v961_v43 = vadd.f32 %v960_v15, %v959_v33  ;;  %v966_v44 = vadd.f32 %v965_v38, %v964_v18  ;;  %v973_v24 = vadd.f32 %v972_v29, %v971_v36  ;;  %v914_v54 = vadd.f32 %v913_v40, %v912_v9  ;;  %p1293_p11 = por %p1292_p10, %p1291_p9 }
 0x377   :  { %v928_v26 = vadd.f32 %v927_v30, %v926_v25  ;;  %v919_v51 = vadd.f32 %v918_v46, %v917_v41  ;;  %v956_v4 = vadd.f32 %v955_v42, %v954_v34  ;;  %v998_v60 = vsel %vm599_vm6, %v900_v5, %v1584_v56 }
 0x378   :  { %v962_v48 = vrot.slane %v961_v43, 1  ;;  %v967_v49 = vrot.slane %v966_v44, 2  ;;  %v974_v53 = vrot.slane %v973_v24, 2  ;;  %v999_v21 = vsel %vm601_vm7, %v907_v16, %v998_v60  ;;  %p1294_p12 = pnand %p1293_p11, %p1287_p8 }
 0x379   :  { %v1002_v55 = vsel %vm593_vm3, %v935_v45, %v928_v26  ;;  %v920_v22 = vrot.slane %v919_v51, 1  ;;  %v1000_v3 = vsel %vm603_vm8, %v914_v54, %v999_v21  ;;  %v735_v11 = vadd.f32 %v1552_v19, %v1144_v10 }
 0x37a   :  { %v968_v8 = vadd.f32 %v967_v49, %v966_v44  ;;  %v1003_v57 = vsel %vm595_vm4, %v942_v47, %v1002_v55  ;;  %v963_v58 = vadd.f32 %v962_v48, %v961_v43  ;;  %v975_v52 = vadd.f32 %v974_v53, %v973_v24 }
 0x37b   :  { %v1004_v27 = vsel %vm597_vm5, %v949_v50, %v1003_v57  ;;  %v921_v61 = vadd.f32 %v920_v22, %v919_v51  ;;  %v730_v12 = vadd.f32 %v1144_v10, %v1556_v32  ;;  %v1089_v2 = vadd.f32 %v735_v11, %v1462_v20 }
 0x37c   :  { %v969_v59 = vrot.slane %v968_v8, 1  ;;  %v976_v62 = vrot.slane %v975_v52, 1  ;;  %v1005_v63 = vsel %vm599_vm6, %v956_v4, %v1004_v27 }
 0x37d   :  { %v1001_v9 = vsel %vm605_vm9, %v921_v61, %v1000_v3  ;;  %v1006_v6 = vsel %vm601_vm7, %v963_v58, %v1005_v63  ;;  %v1088_v13 = vadd.f32 %v730_v12, %v1440_v14 }
 0x37e   :  { %v970_v1 = vadd.f32 %v969_v59, %v968_v8  ;;  %v977_v23 = vadd.f32 %v976_v62, %v975_v52  ;;  %1231 = vmatprep.mubr.msk.f32.mxu0 %vm95_vm0, %v1001_v9 }
 0x380   :  { %v1007_v56 = vsel %vm603_vm8, %v970_v1, %v1006_v6 }
 0x381   :  { %v1008_v7 = vsel %vm605_vm9, %v977_v23, %v1007_v56 }
 0x382   :  { %1232 = vmatmul.mubr.msk.f32.vlgmr.msra.gmra.mrb[6].mxu0 %vm95_vm0, %v1008_v7 }
 0x3aa   :  { %v654_v28 = vpop.xlane.xlu0 %653 }
 0x3ab   :  { %v1091_v31 = vmul.f32 %v1089_v2, %v654_v28  ;;  %v1102_v35 = vmul.f32 %v1149_v0, %v654_v28 }
 0x3af   :  { %v651_v17 = vpop.xlane.xlu1 %650 }
 0x3b0   :  { %v1090_v33 = vmul.f32 %v1088_v13, %v651_v17  ;;  %v1101_v19 = vmul.f32 %v1149_v0, %v651_v17 }
 0x455   :  { %v1233_v34 = vpop.f32.mrb[6].mxu0 }
 0x456   :  { %v1093_v18 = vadd.f32 %v1233_v34, %v1091_v31  ;;  %v1079_v36 = vpop.f32.mrb[7].mxu0 }
 0x457   :  { %v1092_v32 = vadd.f32 %v1090_v33, %v1079_v36 }
 0x458   :  { %v1104_v37 = vadd.f32 %v1102_v35, %v1093_v18 }
 0x459   :  { %v1103_v20 = vadd.f32 %v1101_v19, %v1092_v32 }
 0x45a   :  { %1106 = vst.msk [vmem:[#allocation5 + $0x8] sm:$0xff] %vm177_vm1, %v1104_v37 }
 0x45b   :  { %1105 = vst.msk [vmem:[#allocation5] sm:$0xff] %vm177_vm1, %v1103_v20 }
 0x45c   :  { %1297 = shalt.err (!%p1294_p12)
}
 0x45d   :  { %s1298_s3 = scalar_lea.hbm %s1648_s12, 256 }
 0x45e   :  { %p1299_p13 = scmp.ne.s32.totalorder %s1648_s12, %s1298_s3  ;;  %p1302_p0 = scmp.lt.u32.totalorder %s1298_s3, %s1648_s12 }
 0x460   :  { %p1304_p1 = pnand %p1302_p0, %p1299_p13 }
 0x462   :  { %1307 = shalt.err (!%p1304_p1)
}
 0x463   :  { %1118 = dma.vmem_to_hbm [thread:$0]  %s1113_s25, 256, %s1648_s12, [#allocation4], %s1313_s13, %s1313_s13, %s1314_s14  }
 0x464   :  { %1310 = dma.done.wait [#allocation4], 256  }
 0x465   :  { %1311 = vsyncadd [#allocation4], 4294967040 }
 0x466   :  { %1122 = vsyncpa [#allocation3], 1 }
 0x467   :  { %1123 = vsyncpa [#allocation4], 1 }

</bundles_post_ra>
